<compile_context>
chip_gen: v7x
topology: tpu7x:2x2x1
jax: 0.10.0
libtpu: 0.0.40
codegen_flags: <defaults>
</compile_context>

<pallas_src>
import functools

import jax
import jax.numpy as jnp
from jax.experimental import pallas as pl
from jax.experimental.pallas import tpu as pltpu

# layer_sizes = [nx] + [13, 17] + [ny]
NEURONS_PER_HIDDEN_LAYER = [13, 17]

LANE = 128        # lane granularity
SUBLANE = 16      # batch-tile granularity (bf16-packing friendly, >= 8)
PREFERRED_TILE = 512   # large-batch tile: multiple of 256 (v6e/v7x MXU M fill)


def _round_up(n: int, m: int) -> int:
    return ((n + m - 1) // m) * m


def _pick_batch_tile(B: int) -> int:
    """Choose the batch tile (static, derived from the static batch size).

    - Small batch: one tile covering round_up(B, 16) rows (minimal padding).
    - Medium batch: split into >= 2 tiles so the 'parallel' grid axis can be
      sharded across both v7x TensorCores.
    - Large batch: fixed 512-row tiles (mult of 256 -> full MXU LHS fill on
      v6e/v7x, mult of 128 on v5e), many grid steps for pipelining.
    """
    rounded = _round_up(B, SUBLANE)
    if rounded <= 256:
        return rounded
    if rounded <= 2 * PREFERRED_TILE:
        return _round_up((rounded + 1) // 2, SUBLANE)   # exactly 2 tiles
    return PREFERRED_TILE


def mlp_kernel(x_ref, w1_ref, b1_ref, w2_ref, b2_ref, w3_ref, b3_ref, o_ref):
    """Whole (padded) MLP forward for one batch tile; all operands lane-dense."""
    # x arrives in native f32 (single HBM read); cast to bf16 in-register for MXU.
    x = x_ref[...].astype(jnp.bfloat16)                                # [T, 256] bf16
    # hidden layer 1: Linear + ReLU (f32 accumulation & epilogue — v5e-safe)
    h1 = jnp.dot(x, w1_ref[...], preferred_element_type=jnp.float32) + b1_ref[...]
    h1 = jnp.maximum(h1, 0.0)                                          # [T, 128] f32
    # hidden layer 2: Linear + ReLU
    h2 = jnp.dot(h1.astype(jnp.bfloat16), w2_ref[...],
                 preferred_element_type=jnp.float32) + b2_ref[...]
    h2 = jnp.maximum(h2, 0.0)                                          # [T, 128] f32
    # output layer: Linear (no activation); final store rounded to bf16
    out = jnp.dot(h2.astype(jnp.bfloat16), w3_ref[...],
                  preferred_element_type=jnp.float32) + b3_ref[...]
    o_ref[...] = out.astype(o_ref.dtype)                               # [T, 128] bf16


@functools.partial(jax.jit, static_argnums=(2,))
def neural_network_forward(x_nchw, padded_params, ny):
    """Flatten NCHW input, pad batch rows, run the Pallas MLP, slice back to
    the true (B, ny) f32 logits."""
    w1, b1, w2, b2, w3, b3 = padded_params
    B = x_nchw.shape[0]
    nx = x_nchw.shape[1] * x_nchw.shape[2] * x_nchw.shape[3]
    nx_pad, h1_pad = w1.shape
    h2_pad = w2.shape[1]
    ny_pad = w3.shape[1]

    # Static (trace-time) batch-tile choice.
    tile = _pick_batch_tile(B)
    Bp = _round_up(B, tile)
    grid = (Bp // tile,)

    # nn.Flatten() + batch-row (and, if needed, feature) zero-padding.
    # x stays f32: the kernel casts to bf16 in-register (one HBM read of x).
    x_flat = x_nchw.reshape(B, nx)
    x_pad = jnp.pad(x_flat, ((0, Bp - B), (0, nx_pad - nx)))

    resident = lambda i: (0, 0)   # weights/biases stay in VMEM across batch tiles

    param_bytes = sum(p.size * p.dtype.itemsize for p in padded_params)
    flops = 2 * Bp * (nx_pad * h1_pad + h1_pad * h2_pad + h2_pad * ny_pad)
    bytes_accessed = Bp * nx_pad * 4 + param_bytes + Bp * ny_pad * 2

    # VMEM budget: resident weights + double-buffered x (f32) and out (bf16)
    # tiles + headroom.  Clamp well under the v7x 64 MiB per-TC physical VMEM.
    vmem_bytes = param_bytes + 2 * tile * (nx_pad * 4 + ny_pad * 2) + (2 << 20)
    vmem_limit = int(min(max(vmem_bytes, 8 << 20), 48 << 20))

    out_pad = pl.pallas_call(
        mlp_kernel,
        out_shape=jax.ShapeDtypeStruct((Bp, ny_pad), jnp.bfloat16),
        grid_spec=pltpu.PrefetchScalarGridSpec(
            num_scalar_prefetch=0,
            grid=grid,
            in_specs=[
                pl.BlockSpec((tile, nx_pad), lambda i: (i, 0)),   # x tile (f32)
                pl.BlockSpec((nx_pad, h1_pad), resident),         # w1 (bf16)
                pl.BlockSpec((1, h1_pad), resident),              # b1 (f32)
                pl.BlockSpec((h1_pad, h2_pad), resident),         # w2 (bf16)
                pl.BlockSpec((1, h2_pad), resident),              # b2 (f32)
                pl.BlockSpec((h2_pad, ny_pad), resident),         # w3 (bf16)
                pl.BlockSpec((1, ny_pad), resident),              # b3 (f32)
            ],
            out_specs=pl.BlockSpec((tile, ny_pad), lambda i: (i, 0)),
        ),
        compiler_params=pltpu.CompilerParams(
            dimension_semantics=("parallel",),
            vmem_limit_bytes=vmem_limit),
        cost_estimate=pl.CostEstimate(
            flops=flops, transcendentals=0, bytes_accessed=bytes_accessed),
    )(x_pad, w1, b1, w2, b2, w3, b3)

    return out_pad[:B, :ny].astype(jnp.float32)


def init_params(key, layer_sizes):
    """Torch-like U(-1/sqrt(fan_in), 1/sqrt(fan_in)) init.

    Returns (padded_params, raw_params):
      padded: weights bf16 (in_pad, out_pad), biases f32 (1, out_pad), with
              zero padding so padded rows/columns never affect the result.
      raw:    exact f32 (in, out) / (1, out) tensors for the reference check.
    """
    padded, raw = [], []
    for fan_in, fan_out in zip(layer_sizes[:-1], layer_sizes[1:]):
        key, kw, kb = jax.random.split(key, 3)
        bound = 1.0 / jnp.sqrt(jnp.float32(fan_in))
        w = jax.random.uniform(kw, (fan_in, fan_out), jnp.float32, -bound, bound)
        b = jax.random.uniform(kb, (1, fan_out), jnp.float32, -bound, bound)
        raw.extend([w, b])

        in_pad, out_pad = _round_up(fan_in, LANE), _round_up(fan_out, LANE)
        wp = jnp.zeros((in_pad, out_pad), jnp.bfloat16)
        wp = wp.at[:fan_in, :fan_out].set(w.astype(jnp.bfloat16))
        bp = jnp.zeros((1, out_pad), jnp.float32).at[:, :fan_out].set(b)
        padded.extend([wp, bp])
    return tuple(padded), tuple(raw)


def reference_forward(x_nchw, raw_params, operand_dtype=jnp.float32):
    """Pure-JAX reference; operand_dtype=bf16 reproduces the kernel precision."""
    B = x_nchw.shape[0]
    x = x_nchw.reshape(B, -1).astype(operand_dtype)
    w1, b1, w2, b2, w3, b3 = raw_params

    def dense(h, w, b):
        return jnp.dot(h.astype(operand_dtype), w.astype(operand_dtype),
                       preferred_element_type=jnp.float32) + b

    h1 = jnp.maximum(dense(x, w1, b1), 0.0)
    h2 = jnp.maximum(dense(h1, w2, b2), 0.0)
    return dense(h2, w3, b3)


if __name__ == "__main__":
    # Shapes consistent with the module: B=2, C=1, H=W=16 -> nx=256, ny=10 classes.
    B, C, H, W = 2, 1, 16, 16
    nx = C * H * W
    ny = 10
    layer_sizes = [nx] + NEURONS_PER_HIDDEN_LAYER + [ny]

    key = jax.random.PRNGKey(0)
    key, kx = jax.random.split(key)
    x = jax.random.normal(kx, (B, C, H, W), jnp.float32)

    padded_params, raw_params = init_params(key, layer_sizes)

    out = neural_network_forward(x, padded_params, ny)
    out = jax.block_until_ready(out)
    assert out.shape == (B, ny), out.shape

    # Matched-precision reference (bf16 operands, f32 accumulation); kernel adds
    # one extra bf16 rounding on the final store -> still tight tolerance.
    ref_bf16 = reference_forward(x, raw_params, operand_dtype=jnp.bfloat16)
    assert jnp.allclose(out, ref_bf16, atol=2e-2, rtol=2e-2), "mismatch vs bf16 reference"

    # Full-f32 reference: loose tolerance (bf16 operand + output rounding only).
    ref_f32 = reference_forward(x, raw_params, operand_dtype=jnp.float32)
    assert jnp.allclose(out, ref_f32, atol=8e-2, rtol=8e-2), "mismatch vs f32 reference"

    # Exercise a larger, multi-tile batch path (>= 2 grid steps for megacore).
    key, kx2 = jax.random.split(key)
    x_big = jax.random.normal(kx2, (600, C, H, W), jnp.float32)
    out_big = jax.block_until_ready(neural_network_forward(x_big, padded_params, ny))
    ref_big = reference_forward(x_big, raw_params, operand_dtype=jnp.bfloat16)
    assert out_big.shape == (600, ny)
    assert jnp.allclose(out_big, ref_big, atol=2e-2, rtol=2e-2), "mismatch on big batch"

    print("KERNEL_OK")
</pallas_src>

<mosaic_0001>
module attributes {stable_mosaic.version = 11 : i64} {
  func.func @mlp_kernel(%arg0: i32, %arg1: memref<16x256xf32, #tpu.memory_space<vmem>>, %arg2: memref<256x128xbf16, #tpu.memory_space<vmem>>, %arg3: memref<1x128xf32, #tpu.memory_space<vmem>>, %arg4: memref<128x128xbf16, #tpu.memory_space<vmem>>, %arg5: memref<1x128xf32, #tpu.memory_space<vmem>>, %arg6: memref<128x128xbf16, #tpu.memory_space<vmem>>, %arg7: memref<1x128xf32, #tpu.memory_space<vmem>>, %arg8: memref<16x128xbf16, #tpu.memory_space<vmem>>) attributes {dimension_semantics = [#tpu.dimension_semantics<parallel>], iteration_bounds = array<i64: 1>, scalar_prefetch = 0 : i64, scratch_operands = 0 : i64, tpu.core_type = #tpu.core_type<tc>, window_params = [{transform_indices = @transform_0, window_bounds = array<i64: 16, 256>}, {pipeline_mode = #tpu.pipeline_mode<synchronous>, transform_indices = @transform_1, window_bounds = array<i64: 256, 128>}, {pipeline_mode = #tpu.pipeline_mode<synchronous>, transform_indices = @transform_2, window_bounds = array<i64: 1, 128>}, {pipeline_mode = #tpu.pipeline_mode<synchronous>, transform_indices = @transform_3, window_bounds = array<i64: 128, 128>}, {pipeline_mode = #tpu.pipeline_mode<synchronous>, transform_indices = @transform_4, window_bounds = array<i64: 1, 128>}, {pipeline_mode = #tpu.pipeline_mode<synchronous>, transform_indices = @transform_5, window_bounds = array<i64: 128, 128>}, {pipeline_mode = #tpu.pipeline_mode<synchronous>, transform_indices = @transform_6, window_bounds = array<i64: 1, 128>}, {transform_indices = @transform_7, window_bounds = array<i64: 16, 128>}]} {
    %c0 = arith.constant 0 : index
    %c0_0 = arith.constant 0 : index
    %0 = vector.load %arg1[%c0, %c0_0] : memref<16x256xf32, #tpu.memory_space<vmem>>, vector<16x256xf32>
    %1 = arith.truncf %0 : vector<16x256xf32> to vector<16x256xbf16>
    %c0_1 = arith.constant 0 : index
    %c0_2 = arith.constant 0 : index
    %2 = vector.load %arg2[%c0_1, %c0_2] : memref<256x128xbf16, #tpu.memory_space<vmem>>, vector<256x128xbf16>
    %cst = arith.constant dense<0.000000e+00> : vector<16x128xf32>
    %3 = tpu.matmul %1, %2, %cst {dimension_numbers = #tpu.dot_dimension_numbers<[1], [0], [0], [1], [0, 0, 1, 1], [], []>} : vector<16x256xbf16>, vector<256x128xbf16>, vector<16x128xf32> -> vector<16x128xf32>
    %c0_3 = arith.constant 0 : index
    %c0_4 = arith.constant 0 : index
    %4 = vector.load %arg3[%c0_3, %c0_4] : memref<1x128xf32, #tpu.memory_space<vmem>>, vector<1x128xf32>
    %5 = vector.broadcast %4 : vector<1x128xf32> to vector<16x128xf32>
    %6 = arith.addf %3, %5 : vector<16x128xf32>
    %cst_5 = arith.constant 0.000000e+00 : f32
    %7 = vector.broadcast %cst_5 : f32 to vector<16x128xf32>
    %8 = arith.maximumf %6, %7 : vector<16x128xf32>
    %9 = arith.truncf %8 : vector<16x128xf32> to vector<16x128xbf16>
    %c0_6 = arith.constant 0 : index
    %c0_7 = arith.constant 0 : index
    %10 = vector.load %arg4[%c0_6, %c0_7] : memref<128x128xbf16, #tpu.memory_space<vmem>>, vector<128x128xbf16>
    %cst_8 = arith.constant dense<0.000000e+00> : vector<16x128xf32>
    %11 = tpu.matmul %9, %10, %cst_8 {dimension_numbers = #tpu.dot_dimension_numbers<[1], [0], [0], [1], [0, 0, 1, 1], [], []>} : vector<16x128xbf16>, vector<128x128xbf16>, vector<16x128xf32> -> vector<16x128xf32>
    %c0_9 = arith.constant 0 : index
    %c0_10 = arith.constant 0 : index
    %12 = vector.load %arg5[%c0_9, %c0_10] : memref<1x128xf32, #tpu.memory_space<vmem>>, vector<1x128xf32>
    %13 = vector.broadcast %12 : vector<1x128xf32> to vector<16x128xf32>
    %14 = arith.addf %11, %13 : vector<16x128xf32>
    %cst_11 = arith.constant 0.000000e+00 : f32
    %15 = vector.broadcast %cst_11 : f32 to vector<16x128xf32>
    %16 = arith.maximumf %14, %15 : vector<16x128xf32>
    %17 = arith.truncf %16 : vector<16x128xf32> to vector<16x128xbf16>
    %c0_12 = arith.constant 0 : index
    %c0_13 = arith.constant 0 : index
    %18 = vector.load %arg6[%c0_12, %c0_13] : memref<128x128xbf16, #tpu.memory_space<vmem>>, vector<128x128xbf16>
    %cst_14 = arith.constant dense<0.000000e+00> : vector<16x128xf32>
    %19 = tpu.matmul %17, %18, %cst_14 {dimension_numbers = #tpu.dot_dimension_numbers<[1], [0], [0], [1], [0, 0, 1, 1], [], []>} : vector<16x128xbf16>, vector<128x128xbf16>, vector<16x128xf32> -> vector<16x128xf32>
    %c0_15 = arith.constant 0 : index
    %c0_16 = arith.constant 0 : index
    %20 = vector.load %arg7[%c0_15, %c0_16] : memref<1x128xf32, #tpu.memory_space<vmem>>, vector<1x128xf32>
    %21 = vector.broadcast %20 : vector<1x128xf32> to vector<16x128xf32>
    %22 = arith.addf %19, %21 : vector<16x128xf32>
    %23 = arith.truncf %22 : vector<16x128xf32> to vector<16x128xbf16>
    %c0_17 = arith.constant 0 : index
    %c0_18 = arith.constant 0 : index
    %24 = vector.load %arg8[%c0_17, %c0_18] : memref<16x128xbf16, #tpu.memory_space<vmem>>, vector<16x128xbf16>
    tpu.vector_store %arg8[%c0_17, %c0_18], %23 {strides = array<i32>} : memref<16x128xbf16, #tpu.memory_space<vmem>>, vector<16x128xbf16>,
    return
  }
  func.func @transform_0(%arg0: i32) -> (i32, i32) {
    %c0_i32 = arith.constant 0 : i32
    %c0_i32_0 = arith.constant 0 : i32
    return %arg0, %c0_i32 : i32, i32
  }
  func.func @transform_1(%arg0: i32) -> (i32, i32) {
    %c0_i32 = arith.constant 0 : i32
    %c0_i32_0 = arith.constant 0 : i32
    %c0_i32_1 = arith.constant 0 : i32
    return %c0_i32, %c0_i32_0 : i32, i32
  }
  func.func @transform_2(%arg0: i32) -> (i32, i32) {
    %c0_i32 = arith.constant 0 : i32
    %c0_i32_0 = arith.constant 0 : i32
    %c0_i32_1 = arith.constant 0 : i32
    return %c0_i32, %c0_i32_0 : i32, i32
  }
  func.func @transform_3(%arg0: i32) -> (i32, i32) {
    %c0_i32 = arith.constant 0 : i32
    %c0_i32_0 = arith.constant 0 : i32
    %c0_i32_1 = arith.constant 0 : i32
    return %c0_i32, %c0_i32_0 : i32, i32
  }
  func.func @transform_4(%arg0: i32) -> (i32, i32) {
    %c0_i32 = arith.constant 0 : i32
    %c0_i32_0 = arith.constant 0 : i32
    %c0_i32_1 = arith.constant 0 : i32
    return %c0_i32, %c0_i32_0 : i32, i32
  }
  func.func @transform_5(%arg0: i32) -> (i32, i32) {
    %c0_i32 = arith.constant 0 : i32
    %c0_i32_0 = arith.constant 0 : i32
    %c0_i32_1 = arith.constant 0 : i32
    return %c0_i32, %c0_i32_0 : i32, i32
  }
  func.func @transform_6(%arg0: i32) -> (i32, i32) {
    %c0_i32 = arith.constant 0 : i32
    %c0_i32_0 = arith.constant 0 : i32
    %c0_i32_1 = arith.constant 0 : i32
    return %c0_i32, %c0_i32_0 : i32, i32
  }
  func.func @transform_7(%arg0: i32) -> (i32, i32) {
    %c0_i32 = arith.constant 0 : i32
    %c0_i32_0 = arith.constant 0 : i32
    return %arg0, %c0_i32 : i32, i32
  }
}

</mosaic_0001>

<bundles_post_ra>
// kernel: neural_network_forward.1
= control target key start
LH: loop header
LB: loop body
LE: loop exit
PB: predicated region body
PF: predicated region fallthrough
CT: control target
= control target key end

     0   :  { %12 = vsyncpa [#allocation3], 0  ;;  %s829_s0 = inlined_call_operand.vmem [shape: f32[16,256], index: 0, kind: input, shape index: {}]   ;;  %s830_s1 = inlined_call_operand.hbm [shape: bf16[256,128], index: 1, kind: input, shape index: {}]   ;;  %s831_s2 = inlined_call_operand.vmem [shape: f32[1,128], index: 2, kind: input, shape index: {}]   ;;  %s832_s3 = inlined_call_operand.vmem [shape: bf16[128,128], index: 3, kind: input, shape index: {}]   ;;  %s833_s4 = inlined_call_operand.vmem [shape: f32[1,128], index: 4, kind: input, shape index: {}]   ;;  %s834_s5 = inlined_call_operand.hbm [shape: bf16[128,128], index: 5, kind: input, shape index: {}]   ;;  %s835_s6 = inlined_call_operand.vmem [shape: f32[1,128], index: 6, kind: input, shape index: {}]   ;;  %s836_s7 = inlined_call_operand.vmem [shape: bf16[16,128], index: 7, kind: output, shape index: {}]  }
   0x1   :  { %13 = vsyncpa [#allocation5], 0  ;;  %s693_s24 = smov [#allocation2]   ;;  %s645_s28 = scalar_lea.hbm %s830_s1, 2048 }
   0x2   :  { %s21_s25 = sshll.u32 %s693_s24, 4  ;;  %p646_p0 = scmp.ne.s32.totalorder %s830_s1, %s645_s28  ;;  %s22_s25 = int_to_ptr.vmem [resolvable:$true] %s21_s25 }
   0x3   :  { %p649_p1 = scmp.lt.u32.totalorder %s645_s28, %s830_s1 }
   0x5   :  { %p651_p2 = pnand %p649_p1, %p646_p0 }
   0x7   :  { %654 = shalt.err (!%p651_p2)
}
   0x8   :  { %s655_s10 = scalar_lea.vmem %s22_s25, 2048  ;;  %p660_p4 = scmp.lt.s32.totalorder %s22_s25, %s22_s25 }
   0x9   :  { %p656_p3 = scmp.ne.s32.totalorder %s22_s25, %s655_s10  ;;  %p661_p5 = scmp.lt.s32.totalorder %s655_s10, %s655_s10 }
   0xb   :  { %p662_p6 = por %p661_p5, %p660_p4 }
   0xd   :  { %p663_p7 = pnand %p662_p6, %p656_p3 }
   0xf   :  { %666 = shalt.err (!%p663_p7)
}
  0x10   :  { %s694_s11 = smov 64   ;;  %s695_s12 = smov 4  }
  0x11   :  { %27 = dma.hbm_to_vmem [thread:$0]  %s830_s1, 2048, %s22_s25, [#allocation3], %s694_s11, %s694_s11, %s695_s12  }
  0x12   :  { %s696_s15 = smov [#allocation4]   ;;  %s667_s19 = scalar_lea.hbm %s834_s5, 1024 }
  0x13   :  { %s39_s16 = sshll.u32 %s696_s15, 4  ;;  %p668_p8 = scmp.ne.s32.totalorder %s834_s5, %s667_s19  ;;  %s40_s16 = int_to_ptr.vmem [resolvable:$true] %s39_s16 }
  0x14   :  { %p671_p9 = scmp.lt.u32.totalorder %s667_s19, %s834_s5 }
  0x16   :  { %p673_p10 = pnand %p671_p9, %p668_p8 }
  0x18   :  { %676 = shalt.err (!%p673_p10)
}
  0x19   :  { %s677_s24 = scalar_lea.vmem %s40_s16, 1024  ;;  %p682_p12 = scmp.lt.s32.totalorder %s40_s16, %s40_s16 }
  0x1a   :  { %p678_p11 = scmp.ne.s32.totalorder %s40_s16, %s677_s24  ;;  %p683_p13 = scmp.lt.s32.totalorder %s677_s24, %s677_s24 }
  0x1c   :  { %p684_p0 = por %p683_p13, %p682_p12 }
  0x1e   :  { %p685_p1 = pnand %p684_p0, %p678_p11 }
  0x20   :  { %688 = shalt.err (!%p685_p1)
}
  0x21   :  { %45 = dma.hbm_to_vmem [thread:$0]  %s834_s5, 1024, %s40_s16, [#allocation5], %s694_s11, %s694_s11, %s695_s12  }
  0x22   :  { %689 = dma.done.wait [#allocation3], 2048  }
  0x23   :  { %690 = vsyncadd [#allocation3], 4294965248 }
  0x24   :  { %691 = dma.done.wait [#allocation5], 1024  }
  0x25   :  { %692 = vsyncadd [#allocation5], 4294966272  ;;  %v697_v0 = vmov 0.0   ;;  %v613_v1 = vld [vmem:[#allocation2 + $0x40] sm:$0xff]   ;;  %v615_v3 = vld [vmem:[#allocation2 + $0x48] sm:$0xff]   ;;  %vm698_vm0 = vmmov 0  }
  0x26   :  { %567 = vmatprep.subr.bf16.mxu1 %v697_v0  ;;  %v614_v2 = vld [vmem:[#allocation2] sm:$0xff]   ;;  %527 = vmatprep.subr.bf16.mxu0 %v613_v1  ;;  %v616_v4 = vld [vmem:[#allocation2 + $0x8] sm:$0xff]   ;;  %v617_v5 = vld [vmem:[#allocation2 + $0x50] sm:$0xff]  }
  0x27   :  { %528 = vmatpush3.bf16.msra.mxu0 %v614_v2  ;;  %v618_v6 = vld [vmem:[#allocation2 + $0x10] sm:$0xff]   ;;  %v619_v7 = vld [vmem:[#allocation2 + $0x58] sm:$0xff]   ;;  %v621_v9 = vld [vmem:[#allocation2 + $0x60] sm:$0xff]   ;;  %583 = vmatprep.mubr.msk.bf16.mxu1 %vm698_vm0, %v697_v0 }
  0x28   :  { %529 = vmatprep.subr.bf16.mxu0 %v615_v3  ;;  %v620_v8 = vld [vmem:[#allocation2 + $0x18] sm:$0xff]   ;;  %v622_v10 = vld [vmem:[#allocation2 + $0x20] sm:$0xff]   ;;  %v623_v11 = vld [vmem:[#allocation2 + $0x68] sm:$0xff]  }
  0x29   :  { %v56_v12 = vld [vmem:[%s829_s0 + $0x8] sm:$0xff]  ;;  %v58_v13 = vld [vmem:[%s829_s0 + $0x18] sm:$0xff]  ;;  %v629_v16 = vld [vmem:[%s832_s3] sm:$0xff]  }
  0x2a   :  { %v624_v14 = vld [vmem:[#allocation2 + $0x28] sm:$0xff]   ;;  %v60_v15 = vpack.c.bf16 %v58_v13, %v56_v12  ;;  %v625_v17 = vld [vmem:[#allocation2 + $0x70] sm:$0xff]   ;;  %568 = vmatpush3.bf16.msra.mxu1 %v629_v16  ;;  %v627_v20 = vld [vmem:[#allocation2 + $0x78] sm:$0xff]  }
  0x2b   :  { %530 = vmatpush3.bf16.msra.mxu0 %v616_v4  ;;  %v630_v18 = vld [vmem:[%s832_s3 + $0x8] sm:$0xff]   ;;  %v626_v19 = vld [vmem:[#allocation2 + $0x30] sm:$0xff]   ;;  %569 = vmatprep.subr.bf16.mxu1 %v697_v0  ;;  %v628_v22 = vld [vmem:[#allocation2 + $0x38] sm:$0xff]  }
  0x2c   :  { %531 = vmatprep.subr.bf16.mxu0 %v617_v5  ;;  %228 = vmatprep.mubr.bf16.mxu0 %v60_v15  ;;  %v631_v21 = vld [vmem:[%s832_s3 + $0x10] sm:$0xff]   ;;  %v55_v23 = vld [vmem:[%s829_s0] sm:$0xff]  ;;  %v632_v25 = vld [vmem:[%s832_s3 + $0x18] sm:$0xff]  }
  0x2d   :  { %v57_v24 = vld [vmem:[%s829_s0 + $0x10] sm:$0xff]  ;;  %v633_v27 = vld [vmem:[%s832_s3 + $0x20] sm:$0xff]   ;;  %v634_v28 = vld [vmem:[%s832_s3 + $0x28] sm:$0xff]  }
  0x2e   :  { %570 = vmatpush3.bf16.msra.mxu1 %v630_v18  ;;  %v59_v26 = vpack.c.bf16 %v57_v24, %v55_v23  ;;  %v635_v29 = vld [vmem:[%s832_s3 + $0x30] sm:$0xff]   ;;  %v636_v30 = vld [vmem:[%s832_s3 + $0x38] sm:$0xff]   ;;  %v637_v31 = vld [vmem:[#allocation4] sm:$0xff]  }
  0x2f   :  { %532 = vmatpush3.bf16.msra.mxu0 %v618_v6  ;;  %571 = vmatprep.subr.bf16.mxu1 %v697_v0  ;;  %v638_v32 = vld [vmem:[#allocation4 + $0x8] sm:$0xff]   ;;  %v639_v33 = vld [vmem:[#allocation4 + $0x10] sm:$0xff]   ;;  %v640_v34 = vld [vmem:[#allocation4 + $0x18] sm:$0xff]  }
  0x30   :  { %533 = vmatprep.subr.bf16.mxu0 %v619_v7  ;;  %v641_v35 = vld [vmem:[#allocation4 + $0x20] sm:$0xff]   ;;  %v642_v36 = vld [vmem:[#allocation4 + $0x28] sm:$0xff]   ;;  %v643_v49 = vld [vmem:[#allocation4 + $0x30] sm:$0xff]  }
  0x31   :  { %v483_v38 = vld [vmem:[%s831_s2] ss:$0 sm:$0xff]  ;;  %v644_v50 = vld [vmem:[#allocation4 + $0x38] sm:$0xff]  }
  0x32   :  { %572 = vmatpush3.bf16.msra.mxu1 %v631_v21  ;;  %v500_v51 = vld [vmem:[%s833_s4] ss:$0 sm:$0xff] }
  0x33   :  { %534 = vmatpush3.bf16.msra.mxu0 %v620_v8  ;;  %573 = vmatprep.subr.bf16.mxu1 %v697_v0  ;;  %v509_v61 = vld [vmem:[%s835_s6] ss:$0 sm:$0xff] }
  0x34   :  { %535 = vmatprep.subr.bf16.mxu0 %v621_v9 }
  0x36   :  { %574 = vmatpush3.bf16.msra.mxu1 %v632_v25 }
  0x37   :  { %536 = vmatpush3.bf16.msra.mxu0 %v622_v10  ;;  %575 = vmatprep.subr.bf16.mxu1 %v697_v0 }
  0x38   :  { %537 = vmatprep.subr.bf16.mxu0 %v623_v11 }
  0x3a   :  { %576 = vmatpush3.bf16.msra.mxu1 %v633_v27 }
  0x3b   :  { %538 = vmatpush3.bf16.msra.mxu0 %v624_v14  ;;  %577 = vmatprep.subr.bf16.mxu1 %v697_v0 }
  0x3c   :  { %539 = vmatprep.subr.bf16.mxu0 %v625_v17 }
  0x3e   :  { %578 = vmatpush3.bf16.msra.mxu1 %v634_v28 }
  0x3f   :  { %540 = vmatpush3.bf16.msra.mxu0 %v626_v19  ;;  %579 = vmatprep.subr.bf16.mxu1 %v697_v0 }
  0x40   :  { %541 = vmatprep.subr.bf16.mxu0 %v627_v20 }
  0x42   :  { %580 = vmatpush3.bf16.msra.mxu1 %v635_v29 }
  0x43   :  { %542 = vmatpush3.bf16.msra.mxu0 %v628_v22  ;;  %581 = vmatprep.subr.bf16.mxu1 %v697_v0 }
  0x44   :  { %587 = vmatprep.subr.bf16.mxu0 %v697_v0 }
  0x46   :  { %229 = vmatmul.mubr.bf16.vlgmr.msra.gmra.mrb[0].mxu0 %v59_v26  ;;  %582 = vmatpush3.bf16.msra.mxu1 %v636_v30 }
  0x47   :  { %603 = vmatprep.mubr.msk.bf16.mxu0 %vm698_vm0, %v697_v0  ;;  %588 = vmatpush3.bf16.msra.mxu0 %v637_v31 }
  0x48   :  { %589 = vmatprep.subr.bf16.mxu0 %v697_v0 }
  0x4b   :  { %590 = vmatpush3.bf16.msra.mxu0 %v638_v32 }
  0x4c   :  { %591 = vmatprep.subr.bf16.mxu0 %v697_v0 }
  0x4f   :  { %592 = vmatpush3.bf16.msra.mxu0 %v639_v33 }
  0x50   :  { %593 = vmatprep.subr.bf16.mxu0 %v697_v0 }
  0x53   :  { %594 = vmatpush3.bf16.msra.mxu0 %v640_v34 }
  0x54   :  { %595 = vmatprep.subr.bf16.mxu0 %v697_v0 }
  0x57   :  { %596 = vmatpush3.bf16.msra.mxu0 %v641_v35 }
  0x58   :  { %597 = vmatprep.subr.bf16.mxu0 %v697_v0 }
  0x5b   :  { %598 = vmatpush3.bf16.msra.mxu0 %v642_v36 }
  0x5c   :  { %599 = vmatprep.subr.bf16.mxu0 %v697_v0 }
  0x5f   :  { %600 = vmatpush3.bf16.msra.mxu0 %v643_v49 }
  0x60   :  { %601 = vmatprep.subr.bf16.mxu0 %v697_v0 }
  0x63   :  { %602 = vmatpush3.bf16.msra.mxu0 %v644_v50 }
 0x119   :  { %v543_v37 = vpop.f32.mrb[0].mxu0 }
 0x11a   :  { %v544_v39 = vpop.f32.mrb[1].mxu0 }
 0x11b   :  { %v545_v40 = vadd.f32 %v544_v39, %v543_v37  ;;  %v546_v41 = vpop.f32.mrb[2].mxu0 }
 0x11c   :  { %v547_v42 = vpop.f32.mrb[3].mxu0 }
 0x11d   :  { %v231_v43 = vadd.f32 %v545_v40, %v483_v38  ;;  %v548_v44 = vadd.f32 %v547_v42, %v546_v41 }
 0x11f   :  { %v234_v45 = vadd.f32 %v548_v44, %v483_v38  ;;  %v237_v46 = vmax.f32 %v231_v43, 0.0 }
 0x121   :  { %v238_v47 = vmax.f32 %v234_v45, 0.0 }
 0x123   :  { %v239_v48 = vpack.c.bf16 %v238_v47, %v237_v46 }
 0x125   :  { %584 = vmatmul.mubr.bf16.vlgmr.msra.gmra.mrb[0].mxu1 %v239_v48 }
 0x1f8   :  { %v345_v52 = vpop.f32.mrb[0].mxu1 }
 0x1f9   :  { %v346_v53 = vadd.f32 %v500_v51, %v345_v52  ;;  %v585_v54 = vpop.f32.mrb[1].mxu1 }
 0x1fa   :  { %v348_v55 = vpop.f32.mrb[2].mxu1 }
 0x1fb   :  { %v349_v56 = vadd.f32 %v500_v51, %v348_v55  ;;  %v586_v57 = vpop.f32.mrb[3].mxu1  ;;  %v352_v58 = vmax.f32 %v346_v53, 0.0 }
 0x1fd   :  { %v353_v59 = vmax.f32 %v349_v56, 0.0 }
 0x1ff   :  { %v354_v60 = vpack.c.bf16 %v353_v59, %v352_v58 }
 0x201   :  { %604 = vmatmul.mubr.bf16.vlgmr.msra.gmra.mrb[4].mxu0 %v354_v60 }
 0x2d4   :  { %v460_v62 = vpop.f32.mrb[4].mxu0 }
 0x2d5   :  { %v605_v63 = vpop.f32.mrb[5].mxu0  ;;  %v461_v1 = vadd.f32 %v509_v61, %v460_v62 }
 0x2d6   :  { %v463_v0 = vpop.f32.mrb[6].mxu0 }
 0x2d7   :  { %v464_v2 = vadd.f32 %v509_v61, %v463_v0  ;;  %v606_v3 = vpop.f32.mrb[7].mxu0 }
 0x2d9   :  { %v525_v4 = vpack.c.bf16 %v464_v2, %v461_v1 }
 0x2db   :  { %526 = vst [vmem:[%s836_s7] sm:$0xff] %v525_v4  }
 0x2dc   :  { %481 = vsyncpa [#allocation3], 1 }
 0x2dd   :  { %482 = vsyncpa [#allocation5], 1 }

</bundles_post_ra>
